<compile_context>
chip_gen: v5e
topology: v5e:2x2
jax: 0.10.0
libtpu: 0.0.40
codegen_flags: <defaults>
</compile_context>

<pallas_src>
import jax
import jax.numpy as jnp
from jax.experimental import pallas as pl
from jax.experimental.pallas import tpu as pltpu


def value_sa_kernel(x_ref, u_ref, w1x_ref, w1u_ref, b1_ref,
                    w2_ref, b2_ref, w3_ref, b3_ref, o_ref):
    # l1 (+ fused concat via split weights) + ReLU
    h1 = jnp.dot(x_ref[...], w1x_ref[...], preferred_element_type=jnp.float32)
    h1 = h1 + jnp.dot(u_ref[...], w1u_ref[...], preferred_element_type=jnp.float32)
    h1 = jnp.maximum(h1 + b1_ref[...], 0.0)

    # l2 + ReLU
    h2 = jnp.dot(h1, w2_ref[...], preferred_element_type=jnp.float32)
    h2 = jnp.maximum(h2 + b2_ref[...], 0.0)

    # l3: output width 1 -> VPU multiply + lane reduction instead of an N=1 MXU matmul.
    # w3_ref is a (1, H) row; b3 is a scalar in SMEM.
    out = jnp.sum(h2 * w3_ref[...], axis=-1, keepdims=True) + b3_ref[0, 0]
    o_ref[...] = out.astype(o_ref.dtype)


def value_sa_forward(x, u, params, *, batch_tile=512):
    """Pallas implementation of ValueSA.forward(x, u)."""
    w1x, w1u, b1, w2, b2, w3, b3 = params
    B, obs_dim = x.shape
    _, action_dim = u.shape
    H = w1x.shape[1]

    # Batch tile: full batch when small (satisfies the "equal full dim" rule),
    # otherwise a lane-pipeline-friendly tile.
    TB = B if B <= batch_tile else batch_tile
    nb = pl.cdiv(B, TB)

    batch_spec = lambda shape: pl.BlockSpec(shape, lambda i: (0, 0) if False else (0, 0))  # unused
    inv = lambda shape: pl.BlockSpec(shape, lambda i: (0, 0))          # grid-invariant weights
    tiled = lambda shape: pl.BlockSpec(shape, lambda i: (i, 0))        # batch-tiled activations

    return pl.pallas_call(
        value_sa_kernel,
        out_shape=jax.ShapeDtypeStruct((B, 1), x.dtype),
        grid=(nb,),
        in_specs=[
            tiled((TB, obs_dim)),        # x
            tiled((TB, action_dim)),     # u
            inv((obs_dim, H)),           # w1_x
            inv((action_dim, H)),        # w1_u
            inv((1, H)),                 # b1
            inv((H, H)),                 # w2
            inv((1, H)),                 # b2
            inv((1, H)),                 # w3 (row layout for VPU reduce)
            pl.BlockSpec(memory_space=pltpu.MemorySpace.SMEM),  # b3 scalar
        ],
        out_specs=tiled((TB, 1)),
        compiler_params=pltpu.CompilerParams(
            dimension_semantics=("parallel",),
        ),
    )(x, u, w1x, w1u, b1, w2, b2, w3, b3)


def init_params(key, obs_dim, action_dim, hidden_dim, dtype=jnp.float32):
    """Deterministic synthetic init matching nn.Linear shapes.
    Weights are stored transposed vs. PyTorch ([in, out]); w1 is pre-split into
    its obs and action halves, and w3 is stored as a (1, H) row."""
    d_in = obs_dim + action_dim
    k1, k2, k3, k4, k5, k6 = jax.random.split(key, 6)
    scale1 = 1.0 / jnp.sqrt(d_in)
    scale2 = 1.0 / jnp.sqrt(hidden_dim)
    w1 = jax.random.uniform(k1, (d_in, hidden_dim), dtype, -scale1, scale1)
    w1x, w1u = w1[:obs_dim], w1[obs_dim:]
    b1 = jax.random.uniform(k2, (1, hidden_dim), dtype, -scale1, scale1)
    w2 = jax.random.uniform(k3, (hidden_dim, hidden_dim), dtype, -scale2, scale2)
    b2 = jax.random.uniform(k4, (1, hidden_dim), dtype, -scale2, scale2)
    w3 = jax.random.uniform(k5, (1, hidden_dim), dtype, -scale2, scale2)  # (1, H) row
    b3 = jax.random.uniform(k6, (1, 1), dtype, -scale2, scale2)
    return (w1x, w1u, b1, w2, b2, w3, b3)


def value_sa_reference(x, u, params):
    w1x, w1u, b1, w2, b2, w3, b3 = params
    w1 = jnp.concatenate([w1x, w1u], axis=0)
    xu = jnp.concatenate([x, u], axis=-1)
    h1 = jnp.maximum(xu @ w1 + b1, 0.0)
    h2 = jnp.maximum(h1 @ w2 + b2, 0.0)
    return h2 @ w3.T + b3


if __name__ == "__main__":
    obs_dim, action_dim, hidden_dim = 24, 8, 32
    batch = 8

    key = jax.random.PRNGKey(0)
    kx, ku, kp = jax.random.split(key, 3)
    x = jax.random.normal(kx, (batch, obs_dim), jnp.float32)
    u = jax.random.normal(ku, (batch, action_dim), jnp.float32)
    params = init_params(kp, obs_dim, action_dim, hidden_dim)

    out = value_sa_forward(x, u, params)
    out = jax.block_until_ready(out)

    ref = value_sa_reference(x, u, params)
    assert out.shape == (batch, 1), out.shape
    assert jnp.allclose(out, ref, atol=1e-5, rtol=1e-5), (out, ref)

    print("KERNEL_OK")
</pallas_src>

<mosaic_0001>
module attributes {stable_mosaic.version = 11 : i64} {
  func.func @value_sa_kernel(%arg0: i32, %arg1: memref<8x24xf32, #tpu.memory_space<vmem>>, %arg2: memref<8x8xf32, #tpu.memory_space<vmem>>, %arg3: memref<24x32xf32, #tpu.memory_space<vmem>>, %arg4: memref<8x32xf32, #tpu.memory_space<vmem>>, %arg5: memref<1x32xf32, #tpu.memory_space<vmem>>, %arg6: memref<32x32xf32, #tpu.memory_space<vmem>>, %arg7: memref<1x32xf32, #tpu.memory_space<vmem>>, %arg8: memref<1x32xf32, #tpu.memory_space<vmem>>, %arg9: memref<1x1xf32, #tpu.memory_space<smem>>, %arg10: memref<8x1xf32, #tpu.memory_space<vmem>>) attributes {dimension_semantics = [#tpu.dimension_semantics<parallel>], iteration_bounds = array<i64: 1>, scalar_prefetch = 0 : i64, scratch_operands = 0 : i64, tpu.core_type = #tpu.core_type<tc>, window_params = [{transform_indices = @transform_0, window_bounds = array<i64: 8, 24>}, {transform_indices = @transform_1, window_bounds = array<i64: 8, 8>}, {pipeline_mode = #tpu.pipeline_mode<synchronous>, transform_indices = @transform_2, window_bounds = array<i64: 24, 32>}, {pipeline_mode = #tpu.pipeline_mode<synchronous>, transform_indices = @transform_3, window_bounds = array<i64: 8, 32>}, {pipeline_mode = #tpu.pipeline_mode<synchronous>, transform_indices = @transform_4, window_bounds = array<i64: 1, 32>}, {pipeline_mode = #tpu.pipeline_mode<synchronous>, transform_indices = @transform_5, window_bounds = array<i64: 32, 32>}, {pipeline_mode = #tpu.pipeline_mode<synchronous>, transform_indices = @transform_6, window_bounds = array<i64: 1, 32>}, {pipeline_mode = #tpu.pipeline_mode<synchronous>, transform_indices = @transform_7, window_bounds = array<i64: 1, 32>}, {transform_indices = @transform_8, window_bounds = array<i64: 1, 1>}, {transform_indices = @transform_9, window_bounds = array<i64: 8, 1>}]} {
    %c0 = arith.constant 0 : index
    %c0_0 = arith.constant 0 : index
    %0 = vector.load %arg1[%c0, %c0_0] : memref<8x24xf32, #tpu.memory_space<vmem>>, vector<8x24xf32>
    %c0_1 = arith.constant 0 : index
    %c0_2 = arith.constant 0 : index
    %1 = vector.load %arg3[%c0_1, %c0_2] : memref<24x32xf32, #tpu.memory_space<vmem>>, vector<24x32xf32>
    %cst = arith.constant dense<0.000000e+00> : vector<8x32xf32>
    %2 = tpu.matmul %0, %1, %cst {dimension_numbers = #tpu.dot_dimension_numbers<[1], [0], [0], [1], [0, 0, 1, 1], [], []>} : vector<8x24xf32>, vector<24x32xf32>, vector<8x32xf32> -> vector<8x32xf32>
    %c0_3 = arith.constant 0 : index
    %c0_4 = arith.constant 0 : index
    %3 = vector.load %arg2[%c0_3, %c0_4] : memref<8x8xf32, #tpu.memory_space<vmem>>, vector<8x8xf32>
    %c0_5 = arith.constant 0 : index
    %c0_6 = arith.constant 0 : index
    %4 = vector.load %arg4[%c0_5, %c0_6] : memref<8x32xf32, #tpu.memory_space<vmem>>, vector<8x32xf32>
    %cst_7 = arith.constant dense<0.000000e+00> : vector<8x32xf32>
    %5 = tpu.matmul %3, %4, %cst_7 {dimension_numbers = #tpu.dot_dimension_numbers<[1], [0], [0], [1], [0, 0, 1, 1], [], []>} : vector<8x8xf32>, vector<8x32xf32>, vector<8x32xf32> -> vector<8x32xf32>
    %6 = arith.addf %2, %5 : vector<8x32xf32>
    %c0_8 = arith.constant 0 : index
    %c0_9 = arith.constant 0 : index
    %7 = vector.load %arg5[%c0_8, %c0_9] : memref<1x32xf32, #tpu.memory_space<vmem>>, vector<1x32xf32>
    %8 = vector.broadcast %7 : vector<1x32xf32> to vector<8x32xf32>
    %9 = arith.addf %6, %8 : vector<8x32xf32>
    %cst_10 = arith.constant 0.000000e+00 : f32
    %10 = vector.broadcast %cst_10 : f32 to vector<8x32xf32>
    %11 = arith.maximumf %9, %10 : vector<8x32xf32>
    %c0_11 = arith.constant 0 : index
    %c0_12 = arith.constant 0 : index
    %12 = vector.load %arg6[%c0_11, %c0_12] : memref<32x32xf32, #tpu.memory_space<vmem>>, vector<32x32xf32>
    %cst_13 = arith.constant dense<0.000000e+00> : vector<8x32xf32>
    %13 = tpu.matmul %11, %12, %cst_13 {dimension_numbers = #tpu.dot_dimension_numbers<[1], [0], [0], [1], [0, 0, 1, 1], [], []>} : vector<8x32xf32>, vector<32x32xf32>, vector<8x32xf32> -> vector<8x32xf32>
    %c0_14 = arith.constant 0 : index
    %c0_15 = arith.constant 0 : index
    %14 = vector.load %arg7[%c0_14, %c0_15] : memref<1x32xf32, #tpu.memory_space<vmem>>, vector<1x32xf32>
    %15 = vector.broadcast %14 : vector<1x32xf32> to vector<8x32xf32>
    %16 = arith.addf %13, %15 : vector<8x32xf32>
    %cst_16 = arith.constant 0.000000e+00 : f32
    %17 = vector.broadcast %cst_16 : f32 to vector<8x32xf32>
    %18 = arith.maximumf %16, %17 : vector<8x32xf32>
    %c0_17 = arith.constant 0 : index
    %c0_18 = arith.constant 0 : index
    %19 = vector.load %arg8[%c0_17, %c0_18] : memref<1x32xf32, #tpu.memory_space<vmem>>, vector<1x32xf32>
    %20 = vector.broadcast %19 : vector<1x32xf32> to vector<8x32xf32>
    %21 = arith.mulf %18, %20 : vector<8x32xf32>
    %cst_19 = arith.constant dense<0.000000e+00> : vector<8xf32>
    %22 = vector.multi_reduction <add>, %21, %cst_19 [1] : vector<8x32xf32> to vector<8xf32>
    %23 = vector.shape_cast %22 : vector<8xf32> to vector<8x1xf32>
    %c0_20 = arith.constant 0 : index
    %c0_21 = arith.constant 0 : index
    %24 = memref.load %arg9[%c0_20, %c0_21] : memref<1x1xf32, #tpu.memory_space<smem>>
    %25 = vector.broadcast %24 : f32 to vector<8x1xf32>
    %26 = arith.addf %23, %25 : vector<8x1xf32>
    %c0_22 = arith.constant 0 : index
    %c0_23 = arith.constant 0 : index
    %27 = vector.load %arg10[%c0_22, %c0_23] : memref<8x1xf32, #tpu.memory_space<vmem>>, vector<8x1xf32>
    tpu.vector_store %arg10[%c0_22, %c0_23], %26 {strides = array<i32>} : memref<8x1xf32, #tpu.memory_space<vmem>>, vector<8x1xf32>,
    return
  }
  func.func @transform_0(%arg0: i32) -> (i32, i32) {
    %c0_i32 = arith.constant 0 : i32
    %c0_i32_0 = arith.constant 0 : i32
    return %arg0, %c0_i32 : i32, i32
  }
  func.func @transform_1(%arg0: i32) -> (i32, i32) {
    %c0_i32 = arith.constant 0 : i32
    %c0_i32_0 = arith.constant 0 : i32
    return %arg0, %c0_i32 : i32, i32
  }
  func.func @transform_2(%arg0: i32) -> (i32, i32) {
    %c0_i32 = arith.constant 0 : i32
    %c0_i32_0 = arith.constant 0 : i32
    %c0_i32_1 = arith.constant 0 : i32
    return %c0_i32, %c0_i32_0 : i32, i32
  }
  func.func @transform_3(%arg0: i32) -> (i32, i32) {
    %c0_i32 = arith.constant 0 : i32
    %c0_i32_0 = arith.constant 0 : i32
    %c0_i32_1 = arith.constant 0 : i32
    return %c0_i32, %c0_i32_0 : i32, i32
  }
  func.func @transform_4(%arg0: i32) -> (i32, i32) {
    %c0_i32 = arith.constant 0 : i32
    %c0_i32_0 = arith.constant 0 : i32
    %c0_i32_1 = arith.constant 0 : i32
    return %c0_i32, %c0_i32_0 : i32, i32
  }
  func.func @transform_5(%arg0: i32) -> (i32, i32) {
    %c0_i32 = arith.constant 0 : i32
    %c0_i32_0 = arith.constant 0 : i32
    %c0_i32_1 = arith.constant 0 : i32
    return %c0_i32, %c0_i32_0 : i32, i32
  }
  func.func @transform_6(%arg0: i32) -> (i32, i32) {
    %c0_i32 = arith.constant 0 : i32
    %c0_i32_0 = arith.constant 0 : i32
    %c0_i32_1 = arith.constant 0 : i32
    return %c0_i32, %c0_i32_0 : i32, i32
  }
  func.func @transform_7(%arg0: i32) -> (i32, i32) {
    %c0_i32 = arith.constant 0 : i32
    %c0_i32_0 = arith.constant 0 : i32
    %c0_i32_1 = arith.constant 0 : i32
    return %c0_i32, %c0_i32_0 : i32, i32
  }
  func.func @transform_8(%arg0: i32) -> (i32, i32) {
    %c0_i32 = arith.constant 0 : i32
    %c0_i32_0 = arith.constant 0 : i32
    %c0_i32_1 = arith.constant 0 : i32
    return %c0_i32, %c0_i32_0 : i32, i32
  }
  func.func @transform_9(%arg0: i32) -> (i32, i32) {
    %c0_i32 = arith.constant 0 : i32
    %c0_i32_0 = arith.constant 0 : i32
    return %arg0, %c0_i32 : i32, i32
  }
}

</mosaic_0001>

<bundles_post_ra>
// kernel: tpu_custom_call.1
= control target key start
LH: loop header
LB: loop body
LE: loop exit
PB: predicated region body
PF: predicated region fallthrough
CT: control target
= control target key end

     0   :  { %15 = vsyncpa [#allocation4], 0  ;;  %s444_s0 = inlined_call_operand.hbm [shape: f32[8,24], index: 0, kind: input, shape index: {}]   ;;  %s445_s1 = inlined_call_operand.hbm [shape: f32[8,8], index: 1, kind: input, shape index: {}]   ;;  %s446_s2 = inlined_call_operand.hbm [shape: f32[24,32], index: 2, kind: input, shape index: {}]   ;;  %s447_s3 = inlined_call_operand.hbm [shape: f32[8,32], index: 3, kind: input, shape index: {}]   ;;  %s448_s4 = inlined_call_operand.vmem [shape: f32[1,32], index: 4, kind: input, shape index: {}]   ;;  %s449_s5 = inlined_call_operand.hbm [shape: f32[32,32], index: 5, kind: input, shape index: {}]   ;;  %s450_s6 = inlined_call_operand.vmem [shape: f32[1,32], index: 6, kind: input, shape index: {}]   ;;  %s451_s7 = inlined_call_operand.vmem [shape: f32[1,32], index: 7, kind: input, shape index: {}]   ;;  %s452_s8 = inlined_call_operand.<no memory space> [shape: f32[1,1], index: 8, kind: input, shape index: {}]   ;;  %s453_s9 = inlined_call_operand.vmem [shape: f32[8,1], index: 9, kind: output, shape index: {}]  }
   0x1   :  { %16 = vsyncpa [#allocation6], 0  ;;  %s34_s11 = sshll.u32 %s445_s1, 4  ;;  %s35_s11 = int_to_ptr.hbm [resolvable:$true] %s34_s11 }
   0x2   :  { %17 = vsyncpa [#allocation9], 0  ;;  %s357_s12 = smov [#allocation5]   ;;  %s58_s16 = sshll.u32 %s447_s3, 4  ;;  %s59_s16 = int_to_ptr.hbm [resolvable:$true] %s58_s16 }
   0x3   :  { %s36_s13 = sshll.u32 %s357_s12, 4  ;;  %s358_s17 = smov [#allocation8]   ;;  %s37_s13 = int_to_ptr.vmem [resolvable:$true] %s36_s13 }
   0x4   :  { %39 = dma.hbm_to_vmem [thread:$0]  %s35_s11, 128, %s37_s13, [#allocation6]  }
   0x5   :  { %s60_s18 = sshll.u32 %s358_s17, 4  ;;  %s23_s21 = sshll.u32 %s444_s0, 4  ;;  %s61_s18 = int_to_ptr.vmem [resolvable:$true] %s60_s18  ;;  %s24_s21 = int_to_ptr.hbm [resolvable:$true] %s23_s21 }
   0x6   :  { %63 = dma.hbm_to_vmem [thread:$0]  %s59_s16, 128, %s61_s18, [#allocation9]  }
   0x7   :  { %s44_s23 = sshll.u32 %s446_s2, 4  ;;  %s359_s24 = smov [#allocation3]   ;;  %s45_s23 = int_to_ptr.hbm [resolvable:$true] %s44_s23 }
   0x8   :  { %s25_s25 = sshll.u32 %s359_s24, 4  ;;  %s360_s3 = smov [#allocation7]   ;;  %s26_s25 = int_to_ptr.vmem [resolvable:$true] %s25_s25 }
   0x9   :  { %28 = dma.hbm_to_vmem [thread:$0]  %s24_s21, 128, %s26_s25, [#allocation4]  }
   0xa   :  { %s46_s26 = sshll.u32 %s360_s3, 4  ;;  %s361_s27 = smov 128   ;;  %s47_s26 = int_to_ptr.vmem [resolvable:$true] %s46_s26 }
   0xb   :  { %s362_s28 = smov 8   ;;  %s70_s30 = sshll.u32 %s449_s5, 4  ;;  %s71_s30 = int_to_ptr.hbm [resolvable:$true] %s70_s30 }
   0xc   :  { %52 = dma.hbm_to_vmem [thread:$0]  %s45_s23, 384, %s47_s26, [#allocation6], %s361_s27, %s361_s27, %s362_s28  }
   0xd   :  { %s363_s10 = smov [#allocation10]  }
   0xe   :  { %s72_s11 = sshll.u32 %s363_s10, 4  ;;  %s73_s11 = int_to_ptr.vmem [resolvable:$true] %s72_s11 }
   0xf   :  { %78 = dma.hbm_to_vmem [thread:$0]  %s71_s30, 512, %s73_s11, [#allocation9], %s361_s27, %s361_s27, %s362_s28  }
  0x10   :  { %351 = dma.done.wait [#allocation4], 128  }
  0x11   :  { %352 = vsyncadd [#allocation4], 4294967168 }
  0x12   :  { %353 = dma.done.wait [#allocation6], 512  }
  0x13   :  { %354 = vsyncadd [#allocation6], 4294966784 }
  0x14   :  { %355 = dma.done.wait [#allocation9], 640  }
  0x15   :  { %356 = vsyncadd [#allocation9], 4294966656  ;;  %vm111_vm0 = vcmask 64512   ;;  %v108_v0 = vld [vmem:[#allocation7 + $0x10] sm:$0xff]  ;;  %v107_v1 = vld [vmem:[#allocation7 + $0x8] sm:$0xff]  ;;  %vm135_vm1 = vcmask 195584   ;;  %v207_v23 = vstv %s452_s8 }
  0x16   :  { %v110_v2 = vld [vmem:[#allocation8] sm:$0xff]  ;;  %152 = vmatpush.msra.mxu1 %v108_v0  ;;  %v106_v3 = vld [vmem:[#allocation7] sm:$0xff]  ;;  %v105_v5 = vld [vmem:[#allocation3] sm:$0xff]  ;;  %vm173_vm2 = vcmask 261120   ;;  %vm209_vm3 = vcmask 7168  }
  0x17   :  { %130 = vmatpush.msra.mxu0 %v110_v2  ;;  %v109_v4 = vld [vmem:[#allocation5] sm:$0xff]  ;;  %v167_v7 = vld [vmem:[#allocation10 + $0x10] sm:$0xff]  ;;  %v166_v8 = vld [vmem:[#allocation10 + $0x8] sm:$0xff] }
  0x18   :  { %218 = vmatmul.msk.f32.vlgmr.msra.gmra.mxu0 %vm111_vm0, %v109_v4  ;;  %153 = vmatpush.msra.mxu1 %v107_v1  ;;  %v168_v6 = vld [vmem:[#allocation10 + $0x18] sm:$0xff]  ;;  %v165_v9 = vld [vmem:[#allocation10] sm:$0xff]  ;;  %v228_v11 = vld [vmem:[%s448_s4] ss:$0 sm:$0xff] }
  0x19   :  { %189 = vmatpush.msra.mxu2 %v168_v6  ;;  %v229_v16 = vld [vmem:[%s450_s6] ss:$0 sm:$0xff] }
  0x1a   :  { %154 = vmatpush.msra.mxu1 %v106_v3  ;;  %v230_v19 = vld [vmem:[%s451_s7] ss:$0 sm:$0xff] }
  0x1b   :  { %219 = vmatmul.msk.f32.vlgmr.msra.gmra.mxu1 %vm135_vm1, %v105_v5  ;;  %190 = vmatpush.msra.mxu2 %v167_v7 }
  0x1d   :  { %191 = vmatpush.msra.mxu2 %v166_v8 }
  0x1f   :  { %192 = vmatpush.msra.mxu2 %v165_v9 }
  0x95   :  { %v132_v10 = vpop.f32.mrf.mxu0 }
  0x98   :  { %v156_v12 = vpop.f32.mrf.mxu1 }
  0x99   :  { %v157_v13 = vadd.f32 %v156_v12, %v132_v10 }
  0x9b   :  { %v163_v14 = vadd.f32 %v228_v11, %v157_v13 }
  0x9d   :  { %v164_v15 = vmax.f32 %v163_v14, 0.0 }
  0x9f   :  { %220 = vmatmul.msk.f32.vlgmr.msra.gmra.mxu2 %vm173_vm2, %v164_v15 }
 0x122   :  { %v194_v17 = vpop.f32.mrf.mxu2 }
 0x123   :  { %v195_v18 = vadd.f32 %v229_v16, %v194_v17 }
 0x125   :  { %v197_v20 = vmax.f32 %v195_v18, 0.0 }
 0x127   :  { %v202_v21 = vmul.f32 %v230_v19, %v197_v20 }
 0x129   :  { %v203_v22 = vsel %vm173_vm2, %v202_v21, 0.0 }
 0x12a   :  { %204 = vadd.xlane.f32.xlu0 %v203_v22 }
 0x19d   :  { %v205_v24 = vpop.xlane.xlu0 %204 }
 0x19e   :  { %v208_v25 = vadd.f32 %v207_v23, %v205_v24 }
 0x1a0   :  { %210 = vst.msk [vmem:[%s453_s9] sm:$0xff] %vm209_vm3, %v208_v25 }
 0x1a1   :  { %215 = vsyncpa [#allocation4], 1 }
 0x1a2   :  { %216 = vsyncpa [#allocation6], 1 }
 0x1a3   :  { %217 = vsyncpa [#allocation9], 1 }

</bundles_post_ra>
